<compile_context>
chip_gen: v5e
topology: v5e:2x2
jax: 0.10.0
libtpu: 0.0.40
codegen_flags: <defaults>
</compile_context>

<pallas_src>
import functools

import jax
import jax.numpy as jnp
from jax.experimental import pallas as pl
from jax.experimental.pallas import tpu as pltpu

LEAKY_SLOPE = 0.01  # nn.LeakyReLU() default negative_slope


def _round_up(n, m):
    return ((n + m - 1) // m) * m


def _leaky_relu(h):
    return jnp.where(h > 0, h, LEAKY_SLOPE * h)


def actor_kernel(x_ref, w1_ref, b1_ref, w2_ref, b2_ref, w3_ref, b3_ref,
                 w4_ref, b4_ref, adj_ref, g_ref, out_ref, *, n_valid):
    """Per batch tile: 3x(Linear+LeakyReLU) -> Linear -> masked, per-crane-normalized log-probs.

    out[:, j] = log( softmax(logits)[j] * adj[j] / sum_{k in crane(j)} softmax(logits)[k]*adj[k] )
    (global softmax denominator cancels; numerics mirror torch softmax + Categorical).
    """
    # Hidden layers (bf16 weights/activations, f32 accumulation on the MXU).
    h = x_ref[...]                                                             # bf16 (TB, d_in)
    h = jnp.dot(h, w1_ref[...], preferred_element_type=jnp.float32) + b1_ref[...]
    h = _leaky_relu(h).astype(jnp.bfloat16)
    h = jnp.dot(h, w2_ref[...], preferred_element_type=jnp.float32) + b2_ref[...]
    h = _leaky_relu(h).astype(jnp.bfloat16)
    h = jnp.dot(h, w3_ref[...], preferred_element_type=jnp.float32) + b3_ref[...]
    h = _leaky_relu(h).astype(jnp.bfloat16)

    # Output layer, padded lane-dense to 128 columns (only first n_valid are real).
    logits = jnp.dot(h, w4_ref[...], preferred_element_type=jnp.float32) + b4_ref[...]

    lane = jax.lax.broadcasted_iota(jnp.int32, logits.shape, 1)
    valid = lane < n_valid
    logits = jnp.where(valid, logits, jnp.float32(-1e30))          # padded lanes -> ~0 prob

    # Stable softmax numerator (same global-max stabilization as torch F.softmax(dim=1)),
    # scaled by the adjust mask.  Global denominator cancels in the per-crane normalization.
    m = jnp.max(logits, axis=-1, keepdims=True)
    p = jnp.exp(logits - m) * adj_ref[...]                          # ∝ softmax(logits)*adjust

    # Per-crane sums broadcast back to every lane via a block-diagonal grouping matmul (MXU).
    s = jnp.dot(p, g_ref[...], preferred_element_type=jnp.float32)

    logp = jnp.log(p) - jnp.log(s)                                  # normalized per-crane log-prob
    out_ref[...] = jnp.where(valid, logp, 0.0)


def init_params(key, d_in, hidden_sizes, d_out):
    """nn.Linear-style init: U(-1/sqrt(fan_in), 1/sqrt(fan_in)).
    Weights stored (fan_in, fan_out); biases (1, fan_out)."""
    dims = [d_in] + list(hidden_sizes) + [d_out]
    params = []
    for i in range(len(dims) - 1):
        fan_in, fan_out = dims[i], dims[i + 1]
        key, kw, kb = jax.random.split(key, 3)
        bound = 1.0 / jnp.sqrt(jnp.float32(fan_in))
        w = jax.random.uniform(kw, (fan_in, fan_out), jnp.float32, -bound, bound)
        b = jax.random.uniform(kb, (1, fan_out), jnp.float32, -bound, bound)
        params += [w, b]
    return tuple(params)


def prepare_params(params):
    """Cast weights to bf16 (biases stay f32) and pad the output head to 128 lanes."""
    w1, b1, w2, b2, w3, b3, w4, b4 = params
    d_out = w4.shape[1]
    n_pad = _round_up(max(d_out, 1), 128)
    w4p = jnp.zeros((w4.shape[0], n_pad), jnp.bfloat16).at[:, :d_out].set(w4.astype(jnp.bfloat16))
    b4p = jnp.zeros((1, n_pad), jnp.float32).at[:, :d_out].set(b4.astype(jnp.float32))
    return (w1.astype(jnp.bfloat16), b1.astype(jnp.float32),
            w2.astype(jnp.bfloat16), b2.astype(jnp.float32),
            w3.astype(jnp.bfloat16), b3.astype(jnp.float32),
            w4p, b4p)


@functools.partial(jax.jit, static_argnames=("crane_num", "quay_buffer_size"))
def actor_logp(params, x, adjust, *, crane_num, quay_buffer_size):
    """Per-crane normalized log-probabilities, shape (B, crane_num, quay_buffer_size)."""
    B = x.shape[0]
    C, Q = crane_num, quay_buffer_size
    n_valid = C * Q

    w1, b1, w2, b2, w3, b3, w4p, b4p = params
    d_in = w1.shape[0]
    n_pad = w4p.shape[1]

    # Flatten like torch x.reshape(len(x), -1); ship activations as bf16.
    x_flat = x.reshape(B, -1).astype(jnp.bfloat16)
    assert x_flat.shape[1] == d_in

    # Batch tiling: TB=128 matches MXU M and double-buffers cheaply; pad B up to a TB multiple.
    TB = min(128, _round_up(B, 8))
    B_pad = _round_up(B, TB)
    x_pad = jnp.pad(x_flat, ((0, B_pad - B), (0, 0)))

    # adjust.repeat(1, crane_num, 1) flattened, then padded lane-dense to n_pad columns.
    # (pad value 1.0 keeps padded rows/lanes finite; padded lanes are killed by the logit mask.)
    adj_tiled = jnp.tile(adjust.reshape(B, Q).astype(jnp.float32), (1, C))
    adj_pad = jnp.pad(adj_tiled, ((0, B_pad - B), (0, n_pad - n_valid)), constant_values=1.0)

    # Block-diagonal grouping matrix: G[j,k]=1 iff j,k valid and in the same crane group.
    idx = jnp.arange(n_pad)
    same_group = (idx[:, None] // Q) == (idx[None, :] // Q)
    lane_valid = idx < n_valid
    G = (same_group & lane_valid[:, None] & lane_valid[None, :]).astype(jnp.float32)

    const = lambda i: (0, 0)  # weights / biases / G stay resident in VMEM across grid steps
    logp_pad = pl.pallas_call(
        functools.partial(actor_kernel, n_valid=n_valid),
        out_shape=jax.ShapeDtypeStruct((B_pad, n_pad), jnp.float32),
        grid=(B_pad // TB,),
        in_specs=[
            pl.BlockSpec((TB, d_in), lambda i: (i, 0)),
            pl.BlockSpec(w1.shape, const), pl.BlockSpec(b1.shape, const),
            pl.BlockSpec(w2.shape, const), pl.BlockSpec(b2.shape, const),
            pl.BlockSpec(w3.shape, const), pl.BlockSpec(b3.shape, const),
            pl.BlockSpec(w4p.shape, const), pl.BlockSpec(b4p.shape, const),
            pl.BlockSpec((TB, n_pad), lambda i: (i, 0)),
            pl.BlockSpec((n_pad, n_pad), const),
        ],
        out_specs=pl.BlockSpec((TB, n_pad), lambda i: (i, 0)),
        compiler_params=pltpu.CompilerParams(dimension_semantics=("parallel",)),
    )(x_pad, w1, b1, w2, b2, w3, b3, w4p, b4p, adj_pad, G)

    return logp_pad[:B, :n_valid].reshape(B, C, Q)


def actor_forward(params, x, adjust, key, *, crane_num, quay_buffer_size):
    """Matches Actor.forward: (action, log_pi), each (B, crane_num)."""
    logp = actor_logp(params, x, adjust, crane_num=crane_num, quay_buffer_size=quay_buffer_size)
    action = jax.random.categorical(key, logp, axis=-1)                         # (B, C)
    log_pi = jnp.take_along_axis(logp, action[..., None], axis=-1)[..., 0]      # (B, C)
    return action, log_pi


def _reference_probs(params, x, adjust, crane_num, quay_buffer_size):
    """Pure-JAX reference of the torch forward (same bf16 weights), returning per-crane probs."""
    w1, b1, w2, b2, w3, b3, w4p, b4p = params
    B = x.shape[0]
    h = x.reshape(B, -1).astype(jnp.bfloat16)
    for w, b in ((w1, b1), (w2, b2), (w3, b3)):
        h = jnp.dot(h, w, preferred_element_type=jnp.float32) + b
        h = _leaky_relu(h).astype(jnp.bfloat16)
    logits = (jnp.dot(h, w4p, preferred_element_type=jnp.float32) + b4p)[:, :crane_num * quay_buffer_size]
    pi = jax.nn.softmax(logits, axis=1).reshape(B, crane_num, quay_buffer_size)
    pi = pi * adjust.reshape(B, 1, quay_buffer_size)
    return pi / jnp.sum(pi, axis=-1, keepdims=True)


if __name__ == "__main__":
    crane_num = 2
    quay_buffer_size = 8
    dim_attri = 4

    d_in = crane_num * quay_buffer_size * dim_attri    # 64
    d_out = crane_num * quay_buffer_size               # 16

    root = jax.random.PRNGKey(0)
    k_params, k_x, k_adj, k_sample, k_x2, k_adj2, k_sample2 = jax.random.split(root, 7)

    params = prepare_params(init_params(k_params, d_in, (256, 256, 256), d_out))

    # Small case (matches the module's natural shapes).
    batch = 2
    x = jax.random.normal(k_x, (batch, crane_num, quay_buffer_size, dim_attri), jnp.float32)
    adjust = jax.random.uniform(k_adj, (batch, 1, quay_buffer_size), jnp.float32, 0.5, 1.5)
    action, log_pi = actor_forward(params, x, adjust, k_sample,
                                   crane_num=crane_num, quay_buffer_size=quay_buffer_size)
    jax.block_until_ready((action, log_pi))
    assert action.shape == (batch, crane_num) and log_pi.shape == (batch, crane_num)
    assert bool(jnp.all(action >= 0)) and bool(jnp.all(action < quay_buffer_size))
    assert bool(jnp.all(jnp.isfinite(log_pi)))

    # Correctness vs a pure-JAX reference of the torch forward (compare per-crane probabilities).
    logp = actor_logp(params, x, adjust, crane_num=crane_num, quay_buffer_size=quay_buffer_size)
    ref_p = _reference_probs(params, x, adjust, crane_num, quay_buffer_size)
    assert bool(jnp.all(jnp.abs(jnp.exp(logp) - ref_p) < 1e-2)), "kernel probs mismatch vs reference"

    # Larger batch exercising the batched grid (2 x 128-row tiles, parallel on v7x),
    # including zeros in the adjust mask (handled as -inf log-probs, never sampled).
    batch2 = 256
    x2 = jax.random.normal(k_x2, (batch2, crane_num, quay_buffer_size, dim_attri), jnp.float32)
    adjust2 = jax.random.uniform(k_adj2, (batch2, 1, quay_buffer_size), jnp.float32, 0.0, 1.5)
    adjust2 = jnp.where(adjust2 < 0.2, 0.0, adjust2)          # some masked-out slots
    adjust2 = adjust2.at[:, :, 0].set(jnp.maximum(adjust2[:, :, 0], 0.5))  # keep every crane feasible
    action2, log_pi2 = actor_forward(params, x2, adjust2, k_sample2,
                                     crane_num=crane_num, quay_buffer_size=quay_buffer_size)
    jax.block_until_ready((action2, log_pi2))
    assert action2.shape == (batch2, crane_num) and log_pi2.shape == (batch2, crane_num)
    assert bool(jnp.all(action2 >= 0)) and bool(jnp.all(action2 < quay_buffer_size))
    assert bool(jnp.all(jnp.isfinite(log_pi2)))

    print("KERNEL_OK")
</pallas_src>

<mosaic_0001>
module attributes {stable_mosaic.version = 11 : i64} {
  func.func @actor_kernel(%arg0: i32, %arg1: memref<8x64xbf16, #tpu.memory_space<vmem>>, %arg2: memref<64x256xbf16, #tpu.memory_space<vmem>>, %arg3: memref<1x256xf32, #tpu.memory_space<vmem>>, %arg4: memref<256x256xbf16, #tpu.memory_space<vmem>>, %arg5: memref<1x256xf32, #tpu.memory_space<vmem>>, %arg6: memref<256x256xbf16, #tpu.memory_space<vmem>>, %arg7: memref<1x256xf32, #tpu.memory_space<vmem>>, %arg8: memref<256x128xbf16, #tpu.memory_space<vmem>>, %arg9: memref<1x128xf32, #tpu.memory_space<vmem>>, %arg10: memref<8x128xf32, #tpu.memory_space<vmem>>, %arg11: memref<128x128xf32, #tpu.memory_space<vmem>>, %arg12: memref<8x128xf32, #tpu.memory_space<vmem>>) attributes {dimension_semantics = [#tpu.dimension_semantics<parallel>], iteration_bounds = array<i64: 1>, scalar_prefetch = 0 : i64, scratch_operands = 0 : i64, tpu.core_type = #tpu.core_type<tc>, window_params = [{transform_indices = @transform_0, window_bounds = array<i64: 8, 64>}, {pipeline_mode = #tpu.pipeline_mode<synchronous>, transform_indices = @transform_1, window_bounds = array<i64: 64, 256>}, {pipeline_mode = #tpu.pipeline_mode<synchronous>, transform_indices = @transform_2, window_bounds = array<i64: 1, 256>}, {pipeline_mode = #tpu.pipeline_mode<synchronous>, transform_indices = @transform_3, window_bounds = array<i64: 256, 256>}, {pipeline_mode = #tpu.pipeline_mode<synchronous>, transform_indices = @transform_4, window_bounds = array<i64: 1, 256>}, {pipeline_mode = #tpu.pipeline_mode<synchronous>, transform_indices = @transform_5, window_bounds = array<i64: 256, 256>}, {pipeline_mode = #tpu.pipeline_mode<synchronous>, transform_indices = @transform_6, window_bounds = array<i64: 1, 256>}, {pipeline_mode = #tpu.pipeline_mode<synchronous>, transform_indices = @transform_7, window_bounds = array<i64: 256, 128>}, {pipeline_mode = #tpu.pipeline_mode<synchronous>, transform_indices = @transform_8, window_bounds = array<i64: 1, 128>}, {transform_indices = @transform_9, window_bounds = array<i64: 8, 128>}, {pipeline_mode = #tpu.pipeline_mode<synchronous>, transform_indices = @transform_10, window_bounds = array<i64: 128, 128>}, {transform_indices = @transform_11, window_bounds = array<i64: 8, 128>}]} {
    %c0 = arith.constant 0 : index
    %c0_0 = arith.constant 0 : index
    %0 = vector.load %arg1[%c0, %c0_0] : memref<8x64xbf16, #tpu.memory_space<vmem>>, vector<8x64xbf16>
    %c0_1 = arith.constant 0 : index
    %c0_2 = arith.constant 0 : index
    %1 = vector.load %arg2[%c0_1, %c0_2] : memref<64x256xbf16, #tpu.memory_space<vmem>>, vector<64x256xbf16>
    %cst = arith.constant dense<0.000000e+00> : vector<8x256xf32>
    %2 = tpu.matmul %0, %1, %cst {dimension_numbers = #tpu.dot_dimension_numbers<[1], [0], [0], [1], [0, 0, 1, 1], [], []>} : vector<8x64xbf16>, vector<64x256xbf16>, vector<8x256xf32> -> vector<8x256xf32>
    %c0_3 = arith.constant 0 : index
    %c0_4 = arith.constant 0 : index
    %3 = vector.load %arg3[%c0_3, %c0_4] : memref<1x256xf32, #tpu.memory_space<vmem>>, vector<1x256xf32>
    %4 = vector.broadcast %3 : vector<1x256xf32> to vector<8x256xf32>
    %5 = arith.addf %2, %4 : vector<8x256xf32>
    %cst_5 = arith.constant 0.000000e+00 : f32
    %6 = vector.broadcast %cst_5 : f32 to vector<8x256xf32>
    %7 = arith.cmpf ogt, %5, %6 : vector<8x256xf32>
    %cst_6 = arith.constant 0.00999999977 : f32
    %8 = vector.broadcast %cst_6 : f32 to vector<8x256xf32>
    %9 = arith.mulf %8, %5 : vector<8x256xf32>
    %10 = arith.select %7, %5, %9 : vector<8x256xi1>, vector<8x256xf32>
    %11 = arith.truncf %10 : vector<8x256xf32> to vector<8x256xbf16>
    %c0_7 = arith.constant 0 : index
    %c0_8 = arith.constant 0 : index
    %12 = vector.load %arg4[%c0_7, %c0_8] : memref<256x256xbf16, #tpu.memory_space<vmem>>, vector<256x256xbf16>
    %cst_9 = arith.constant dense<0.000000e+00> : vector<8x256xf32>
    %13 = tpu.matmul %11, %12, %cst_9 {dimension_numbers = #tpu.dot_dimension_numbers<[1], [0], [0], [1], [0, 0, 1, 1], [], []>} : vector<8x256xbf16>, vector<256x256xbf16>, vector<8x256xf32> -> vector<8x256xf32>
    %c0_10 = arith.constant 0 : index
    %c0_11 = arith.constant 0 : index
    %14 = vector.load %arg5[%c0_10, %c0_11] : memref<1x256xf32, #tpu.memory_space<vmem>>, vector<1x256xf32>
    %15 = vector.broadcast %14 : vector<1x256xf32> to vector<8x256xf32>
    %16 = arith.addf %13, %15 : vector<8x256xf32>
    %cst_12 = arith.constant 0.000000e+00 : f32
    %17 = vector.broadcast %cst_12 : f32 to vector<8x256xf32>
    %18 = arith.cmpf ogt, %16, %17 : vector<8x256xf32>
    %cst_13 = arith.constant 0.00999999977 : f32
    %19 = vector.broadcast %cst_13 : f32 to vector<8x256xf32>
    %20 = arith.mulf %19, %16 : vector<8x256xf32>
    %21 = arith.select %18, %16, %20 : vector<8x256xi1>, vector<8x256xf32>
    %22 = arith.truncf %21 : vector<8x256xf32> to vector<8x256xbf16>
    %c0_14 = arith.constant 0 : index
    %c0_15 = arith.constant 0 : index
    %23 = vector.load %arg6[%c0_14, %c0_15] : memref<256x256xbf16, #tpu.memory_space<vmem>>, vector<256x256xbf16>
    %cst_16 = arith.constant dense<0.000000e+00> : vector<8x256xf32>
    %24 = tpu.matmul %22, %23, %cst_16 {dimension_numbers = #tpu.dot_dimension_numbers<[1], [0], [0], [1], [0, 0, 1, 1], [], []>} : vector<8x256xbf16>, vector<256x256xbf16>, vector<8x256xf32> -> vector<8x256xf32>
    %c0_17 = arith.constant 0 : index
    %c0_18 = arith.constant 0 : index
    %25 = vector.load %arg7[%c0_17, %c0_18] : memref<1x256xf32, #tpu.memory_space<vmem>>, vector<1x256xf32>
    %26 = vector.broadcast %25 : vector<1x256xf32> to vector<8x256xf32>
    %27 = arith.addf %24, %26 : vector<8x256xf32>
    %cst_19 = arith.constant 0.000000e+00 : f32
    %28 = vector.broadcast %cst_19 : f32 to vector<8x256xf32>
    %29 = arith.cmpf ogt, %27, %28 : vector<8x256xf32>
    %cst_20 = arith.constant 0.00999999977 : f32
    %30 = vector.broadcast %cst_20 : f32 to vector<8x256xf32>
    %31 = arith.mulf %30, %27 : vector<8x256xf32>
    %32 = arith.select %29, %27, %31 : vector<8x256xi1>, vector<8x256xf32>
    %33 = arith.truncf %32 : vector<8x256xf32> to vector<8x256xbf16>
    %c0_21 = arith.constant 0 : index
    %c0_22 = arith.constant 0 : index
    %34 = vector.load %arg8[%c0_21, %c0_22] : memref<256x128xbf16, #tpu.memory_space<vmem>>, vector<256x128xbf16>
    %cst_23 = arith.constant dense<0.000000e+00> : vector<8x128xf32>
    %35 = tpu.matmul %33, %34, %cst_23 {dimension_numbers = #tpu.dot_dimension_numbers<[1], [0], [0], [1], [0, 0, 1, 1], [], []>} : vector<8x256xbf16>, vector<256x128xbf16>, vector<8x128xf32> -> vector<8x128xf32>
    %c0_24 = arith.constant 0 : index
    %c0_25 = arith.constant 0 : index
    %36 = vector.load %arg9[%c0_24, %c0_25] : memref<1x128xf32, #tpu.memory_space<vmem>>, vector<1x128xf32>
    %37 = vector.broadcast %36 : vector<1x128xf32> to vector<8x128xf32>
    %38 = arith.addf %35, %37 : vector<8x128xf32>
    %39 = tpu.iota {dimensions = array<i32: 1>} : vector<8x128xi32>
    %c16_i32 = arith.constant 16 : i32
    %40 = vector.broadcast %c16_i32 : i32 to vector<8x128xi32>
    %41 = arith.cmpi slt, %39, %40 : vector<8x128xi32>
    %cst_26 = arith.constant -1.000000e+30 : f32
    %42 = vector.broadcast %cst_26 : f32 to vector<8x128xf32>
    %43 = arith.select %41, %38, %42 : vector<8x128xi1>, vector<8x128xf32>
    %cst_27 = arith.constant dense<0xFF800000> : vector<8xf32>
    %44 = vector.multi_reduction <maximumf>, %43, %cst_27 [1] : vector<8x128xf32> to vector<8xf32>
    %45 = vector.shape_cast %44 : vector<8xf32> to vector<8x1xf32>
    %46 = vector.broadcast %45 : vector<8x1xf32> to vector<8x128xf32>
    %47 = arith.subf %43, %46 : vector<8x128xf32>
    %48 = math.exp %47 : vector<8x128xf32>
    %c0_28 = arith.constant 0 : index
    %c0_29 = arith.constant 0 : index
    %49 = vector.load %arg10[%c0_28, %c0_29] : memref<8x128xf32, #tpu.memory_space<vmem>>, vector<8x128xf32>
    %50 = arith.mulf %48, %49 : vector<8x128xf32>
    %c0_30 = arith.constant 0 : index
    %c0_31 = arith.constant 0 : index
    %51 = vector.load %arg11[%c0_30, %c0_31] : memref<128x128xf32, #tpu.memory_space<vmem>>, vector<128x128xf32>
    %cst_32 = arith.constant dense<0.000000e+00> : vector<8x128xf32>
    %52 = tpu.matmul %50, %51, %cst_32 {dimension_numbers = #tpu.dot_dimension_numbers<[1], [0], [0], [1], [0, 0, 1, 1], [], []>} : vector<8x128xf32>, vector<128x128xf32>, vector<8x128xf32> -> vector<8x128xf32>
    %53 = math.log %50 : vector<8x128xf32>
    %54 = math.log %52 : vector<8x128xf32>
    %55 = arith.subf %53, %54 : vector<8x128xf32>
    %cst_33 = arith.constant 0.000000e+00 : f32
    %56 = vector.broadcast %cst_33 : f32 to vector<8x128xf32>
    %57 = arith.select %41, %55, %56 : vector<8x128xi1>, vector<8x128xf32>
    %c0_34 = arith.constant 0 : index
    %c0_35 = arith.constant 0 : index
    %58 = vector.load %arg12[%c0_34, %c0_35] : memref<8x128xf32, #tpu.memory_space<vmem>>, vector<8x128xf32>
    tpu.vector_store %arg12[%c0_34, %c0_35], %57 {strides = array<i32>} : memref<8x128xf32, #tpu.memory_space<vmem>>, vector<8x128xf32>,
    return
  }
  func.func @transform_0(%arg0: i32) -> (i32, i32) {
    %c0_i32 = arith.constant 0 : i32
    %c0_i32_0 = arith.constant 0 : i32
    return %arg0, %c0_i32 : i32, i32
  }
  func.func @transform_1(%arg0: i32) -> (i32, i32) {
    %c0_i32 = arith.constant 0 : i32
    %c0_i32_0 = arith.constant 0 : i32
    %c0_i32_1 = arith.constant 0 : i32
    return %c0_i32, %c0_i32_0 : i32, i32
  }
  func.func @transform_2(%arg0: i32) -> (i32, i32) {
    %c0_i32 = arith.constant 0 : i32
    %c0_i32_0 = arith.constant 0 : i32
    %c0_i32_1 = arith.constant 0 : i32
    return %c0_i32, %c0_i32_0 : i32, i32
  }
  func.func @transform_3(%arg0: i32) -> (i32, i32) {
    %c0_i32 = arith.constant 0 : i32
    %c0_i32_0 = arith.constant 0 : i32
    %c0_i32_1 = arith.constant 0 : i32
    return %c0_i32, %c0_i32_0 : i32, i32
  }
  func.func @transform_4(%arg0: i32) -> (i32, i32) {
    %c0_i32 = arith.constant 0 : i32
    %c0_i32_0 = arith.constant 0 : i32
    %c0_i32_1 = arith.constant 0 : i32
    return %c0_i32, %c0_i32_0 : i32, i32
  }
  func.func @transform_5(%arg0: i32) -> (i32, i32) {
    %c0_i32 = arith.constant 0 : i32
    %c0_i32_0 = arith.constant 0 : i32
    %c0_i32_1 = arith.constant 0 : i32
    return %c0_i32, %c0_i32_0 : i32, i32
  }
  func.func @transform_6(%arg0: i32) -> (i32, i32) {
    %c0_i32 = arith.constant 0 : i32
    %c0_i32_0 = arith.constant 0 : i32
    %c0_i32_1 = arith.constant 0 : i32
    return %c0_i32, %c0_i32_0 : i32, i32
  }
  func.func @transform_7(%arg0: i32) -> (i32, i32) {
    %c0_i32 = arith.constant 0 : i32
    %c0_i32_0 = arith.constant 0 : i32
    %c0_i32_1 = arith.constant 0 : i32
    return %c0_i32, %c0_i32_0 : i32, i32
  }
  func.func @transform_8(%arg0: i32) -> (i32, i32) {
    %c0_i32 = arith.constant 0 : i32
    %c0_i32_0 = arith.constant 0 : i32
    %c0_i32_1 = arith.constant 0 : i32
    return %c0_i32, %c0_i32_0 : i32, i32
  }
  func.func @transform_9(%arg0: i32) -> (i32, i32) {
    %c0_i32 = arith.constant 0 : i32
    %c0_i32_0 = arith.constant 0 : i32
    return %arg0, %c0_i32 : i32, i32
  }
  func.func @transform_10(%arg0: i32) -> (i32, i32) {
    %c0_i32 = arith.constant 0 : i32
    %c0_i32_0 = arith.constant 0 : i32
    %c0_i32_1 = arith.constant 0 : i32
    return %c0_i32, %c0_i32_0 : i32, i32
  }
  func.func @transform_11(%arg0: i32) -> (i32, i32) {
    %c0_i32 = arith.constant 0 : i32
    %c0_i32_0 = arith.constant 0 : i32
    return %arg0, %c0_i32 : i32, i32
  }
}

</mosaic_0001>

<bundles_post_ra>
// kernel: tile.7
= control target key start
LH: loop header
LB: loop body
LE: loop exit
PB: predicated region body
PF: predicated region fallthrough
CT: control target
= control target key end

     0   :  { %s10_s10 = smov 3  ;;  %vm12_vm0 = vcmask 64512   ;;  %s29_s11 = smov 8   ;;  %vm19_vm1 = vcmask 130112   ;;  %s49_s0 = inlined_call_operand.vmem [shape: f32[2,2,8], index: 0, kind: input, shape index: {}]   ;;  %s50_s1 = inlined_call_operand.vmem [shape: f32[2,16], index: 1, kind: output, shape index: {}]  }
   0x1   :  { %v27_v0 = vld [vmem:[%s49_s0 + $0x2] sm:$0x3]  ;;  %v8_v1 = vld [vmem:[%s49_s0] sm:$0x3]  ;;  %s15_s0 = smov 3 }
   0x2   :  { %7 = vst [vmem:[#allocation1 + $0x8] sm:$0x3] %v27_v0 }
   0x3   :  { %9 = vst [vmem:[#allocation1] sm:$0x3] %v8_v1 }
   0xa   :  { %v16_v2 = vld [vmem:[#allocation1 + $0x1] ss:$8 sm:%s15_s0]   ;;  %v11_v3 = vld [vmem:[#allocation1] ss:$8 sm:%s10_s10]  }
   0xb   :  { %17 = vrot.lane.b32.xlu0 %v16_v2, %s29_s11  ;;  %13 = vst.msk [vmem:[#allocation0] sm:$0x3] %vm12_vm0, %v11_v3  }
  0x7d   :  { %v18_v4 = vpop.permute.xlu0 %17  }
  0x7e   :  { %20 = vst.msk [vmem:[#allocation0] sm:$0x3] %vm19_vm1, %v18_v4  }
  0x85   :  { %v23_v5 = vld [vmem:[#allocation0] sm:$0x3] }
  0x86   :  { %26 = vst [vmem:[%s50_s1] sm:$0x3] %v23_v5 }

// kernel: actor_logp.1
= control target key start
LH: loop header
LB: loop body
LE: loop exit
PB: predicated region body
PF: predicated region fallthrough
CT: control target
= control target key end

     0   :  { %16 = vsyncpa [#allocation3], 0  ;;  %s1642_s0 = inlined_call_operand.vmem [shape: bf16[8,64], index: 0, kind: input, shape index: {}]   ;;  %s1643_s1 = inlined_call_operand.vmem [shape: bf16[64,256], index: 1, kind: input, shape index: {}]   ;;  %s1644_s2 = inlined_call_operand.vmem [shape: f32[1,256], index: 2, kind: input, shape index: {}]   ;;  %s1645_s3 = inlined_call_operand.hbm [shape: bf16[256,256], index: 3, kind: input, shape index: {}]   ;;  %s1646_s4 = inlined_call_operand.vmem [shape: f32[1,256], index: 4, kind: input, shape index: {}]   ;;  %s1647_s5 = inlined_call_operand.hbm [shape: bf16[256,256], index: 5, kind: input, shape index: {}]   ;;  %s1648_s6 = inlined_call_operand.vmem [shape: f32[1,256], index: 6, kind: input, shape index: {}]   ;;  %s1649_s7 = inlined_call_operand.vmem [shape: bf16[256,128], index: 7, kind: input, shape index: {}]   ;;  %s1650_s8 = inlined_call_operand.vmem [shape: f32[1,128], index: 8, kind: input, shape index: {}]   ;;  %s1651_s9 = inlined_call_operand.vmem [shape: f32[8,128], index: 9, kind: input, shape index: {}]   ;;  %s1652_s10 = inlined_call_operand.vmem [shape: f32[128,128], index: 10, kind: input, shape index: {}]   ;;  %s1653_s11 = inlined_call_operand.vmem [shape: f32[8,128], index: 11, kind: output, shape index: {}]  }
   0x1   :  { %s28_s19 = sshll.u32 %s1645_s3, 4  ;;  %s29_s19 = int_to_ptr.hbm [resolvable:$true] %s28_s19 }
   0x2   :  { %17 = vsyncpa [#allocation5], 0  ;;  %s1403_s20 = smov [#allocation2]   ;;  %s43_s24 = sshll.u32 %s1647_s5, 4  ;;  %s44_s24 = int_to_ptr.hbm [resolvable:$true] %s43_s24 }
   0x3   :  { %s30_s21 = sshll.u32 %s1403_s20, 4  ;;  %s1404_s25 = smov 128   ;;  %s31_s21 = int_to_ptr.vmem [resolvable:$true] %s30_s21 }
   0x4   :  { %s1405_s26 = smov 8   ;;  %s1406_s27 = smov [#allocation4]  }
   0x5   :  { %36 = dma.hbm_to_vmem [thread:$0]  %s29_s19, 4096, %s31_s21, [#allocation3], %s1404_s25, %s1404_s25, %s1405_s26  }
   0x6   :  { %s45_s28 = sshll.u32 %s1406_s27, 4  ;;  %s46_s28 = int_to_ptr.vmem [resolvable:$true] %s45_s28 }
   0x7   :  { %51 = dma.hbm_to_vmem [thread:$0]  %s44_s24, 4096, %s46_s28, [#allocation5], %s1404_s25, %s1404_s25, %s1405_s26  }
   0x8   :  { %1399 = dma.done.wait [#allocation3], 4096  }
   0x9   :  { %1400 = vsyncadd [#allocation3], 4294963200 }
   0xa   :  { %1401 = dma.done.wait [#allocation5], 4096  }
   0xb   :  { %1402 = vsyncadd [#allocation5], 4294963200  ;;  %v924_v0 = vld [vmem:[%s1643_s1 + $0x30] sm:$0xf]  ;;  %v1259_v1 = vld [vmem:[%s1643_s1 + $0x34] sm:$0xf0] }
   0xc   :  { %v916_v2 = vld [vmem:[%s1643_s1 + $0x20] sm:$0xf]  ;;  %v925_v3 = vor.u32 %v1259_v1, %v924_v0  ;;  %v1257_v4 = vld [vmem:[%s1643_s1 + $0x24] sm:$0xf0]  ;;  %v908_v6 = vld [vmem:[%s1643_s1 + $0x10] sm:$0xf] }
   0xd   :  { %v917_v5 = vor.u32 %v1257_v4, %v916_v2  ;;  %v1255_v7 = vld [vmem:[%s1643_s1 + $0x14] sm:$0xf0]  ;;  %v990_v8 = vld [vmem:[#allocation2 + $0x70] sm:$0xf]  ;;  %v1274_v10 = vld [vmem:[#allocation2 + $0x74] sm:$0xf] }
   0xe   :  { %134 = vmatpush.bf16.msra.mxu1 %v925_v3  ;;  %v1275_v9 = vld [vmem:[#allocation2 + $0x74] sm:$0xf0]  ;;  %v992_v11 = vld [vmem:[#allocation2 + $0x78] sm:$0xf0]  ;;  %v909_v12 = vor.u32 %v1255_v7, %v908_v6  ;;  %v982_v15 = vld [vmem:[#allocation2 + $0x60] sm:$0xf] }
   0xf   :  { %v991_v13 = vor.u32 %v1275_v9, %v990_v8  ;;  %v995_v14 = vor.u32 %v1274_v10, %v992_v11  ;;  %v1273_v16 = vld [vmem:[#allocation2 + $0x64] sm:$0xf0]  ;;  %v1272_v17 = vld [vmem:[#allocation2 + $0x64] sm:$0xf]  ;;  %v900_v18 = vld [vmem:[%s1643_s1] sm:$0xf] }
  0x10   :  { %v1253_v19 = vld [vmem:[%s1643_s1 + $0x4] sm:$0xf0]  ;;  %v984_v20 = vld [vmem:[#allocation2 + $0x68] sm:$0xf0]  ;;  %v1258_v21 = vld [vmem:[%s1643_s1 + $0x34] sm:$0xf]  ;;  %v983_v23 = vor.u32 %v1273_v16, %v982_v15 }
  0x11   :  { %v926_v22 = vld [vmem:[%s1643_s1 + $0x38] sm:$0xf0]  ;;  %362 = vmatpush.bf16.msra.mxu2 %v991_v13  ;;  %388 = vmatpush.bf16.msra.mxu0 %v995_v14  ;;  %v987_v24 = vor.u32 %v1272_v17, %v984_v20  ;;  %v974_v25 = vld [vmem:[#allocation2 + $0x50] sm:$0xf]  ;;  %v1271_v26 = vld [vmem:[#allocation2 + $0x54] sm:$0xf0]  ;;  %v901_v29 = vor.u32 %v1253_v19, %v900_v18 }
  0x12   :  { %135 = vmatpush.bf16.msra.mxu1 %v917_v5  ;;  %v1270_v27 = vld [vmem:[#allocation2 + $0x54] sm:$0xf]  ;;  %v976_v28 = vld [vmem:[#allocation2 + $0x58] sm:$0xf0]  ;;  %v1054_v30 = vld [vmem:[#allocation2 + $0xf0] sm:$0xf]  ;;  %v929_v31 = vor.u32 %v1258_v21, %v926_v22  ;;  %v975_v35 = vor.u32 %v1271_v26, %v974_v25 }
  0x13   :  { %v1256_v32 = vld [vmem:[%s1643_s1 + $0x24] sm:$0xf]  ;;  %v918_v33 = vld [vmem:[%s1643_s1 + $0x28] sm:$0xf0]  ;;  %v1291_v34 = vld [vmem:[#allocation2 + $0xf4] sm:$0xf0]  ;;  %v979_v36 = vor.u32 %v1270_v27, %v976_v28 }
  0x14   :  { %v966_v37 = vld [vmem:[#allocation2 + $0x40] sm:$0xf]  ;;  %v1269_v38 = vld [vmem:[#allocation2 + $0x44] sm:$0xf0]  ;;  %v1268_v39 = vld [vmem:[#allocation2 + $0x44] sm:$0xf]  ;;  %v1055_v40 = vor.u32 %v1291_v34, %v1054_v30  ;;  %v921_v46 = vor.u32 %v1256_v32, %v918_v33 }
  0x15   :  { %363 = vmatpush.bf16.msra.mxu2 %v983_v23  ;;  %389 = vmatpush.bf16.msra.mxu0 %v987_v24  ;;  %v968_v41 = vld [vmem:[#allocation2 + $0x48] sm:$0xf0]  ;;  %v1046_v42 = vld [vmem:[#allocation2 + $0xe0] sm:$0xf]  ;;  %v1289_v43 = vld [vmem:[#allocation2 + $0xe4] sm:$0xf0]  ;;  %v967_v49 = vor.u32 %v1269_v38, %v966_v37 }
  0x16   :  { %136 = vmatpush.bf16.msra.mxu1 %v909_v12  ;;  %v71_v44 = vld [vmem:[%s1642_s0] sm:$0xf]  ;;  %vm126_vm0 = vcmask 523264   ;;  %375 = vmatpush.bf16.msra.mxu3 %v1055_v40  ;;  %v1047_v45 = vor.u32 %v1289_v43, %v1046_v42  ;;  %v1254_v47 = vld [vmem:[%s1643_s1 + $0x14] sm:$0xf]  ;;  %v971_v50 = vor.u32 %v1268_v39, %v968_v41 }
  0x17   :  { %v910_v48 = vld [vmem:[%s1643_s1 + $0x18] sm:$0xf0]  ;;  %v958_v51 = vld [vmem:[#allocation2 + $0x30] sm:$0xf]  ;;  %v1267_v52 = vld [vmem:[#allocation2 + $0x34] sm:$0xf0] }
  0x18   :  { %v1266_v53 = vld [vmem:[#allocation2 + $0x34] sm:$0xf]  ;;  %v960_v54 = vld [vmem:[#allocation2 + $0x38] sm:$0xf0]  ;;  %v913_v55 = vor.u32 %v1254_v47, %v910_v48  ;;  %v1252_v56 = vld [vmem:[%s1643_s1 + $0x4] sm:$0xf]  ;;  %v959_v58 = vor.u32 %v1267_v52, %v958_v51 }
  0x19   :  { %364 = vmatpush.bf16.msra.mxu2 %v975_v35  ;;  %390 = vmatpush.bf16.msra.mxu0 %v979_v36  ;;  %v902_v57 = vld [vmem:[%s1643_s1 + $0x8] sm:$0xf0]  ;;  %v963_v59 = vor.u32 %v1266_v53, %v960_v54  ;;  %v1290_v60 = vld [vmem:[#allocation2 + $0xf4] sm:$0xf]  ;;  %v1056_v61 = vld [vmem:[#allocation2 + $0xf8] sm:$0xf0] }
  0x1a   :  { %137 = vmatpush.bf16.msra.mxu1 %v901_v29  ;;  %376 = vmatpush.bf16.msra.mxu3 %v1047_v45  ;;  %v950_v62 = vld [vmem:[#allocation2 + $0x20] sm:$0xf]  ;;  %v1265_v63 = vld [vmem:[#allocation2 + $0x24] sm:$0xf0]  ;;  %v1264_v0 = vld [vmem:[#allocation2 + $0x24] sm:$0xf]  ;;  %v905_v2 = vor.u32 %v1252_v56, %v902_v57  ;;  %v1059_v3 = vor.u32 %v1290_v60, %v1056_v61 }
  0x1b   :  { %v952_v1 = vld [vmem:[#allocation2 + $0x28] sm:$0xf0]  ;;  %v951_v4 = vor.u32 %v1265_v63, %v950_v62  ;;  %v1288_v6 = vld [vmem:[#allocation2 + $0xe4] sm:$0xf]  ;;  %v942_v9 = vld [vmem:[#allocation2 + $0x10] sm:$0xf] }
  0x1c   :  { %v955_v5 = vor.u32 %v1264_v0, %v952_v1  ;;  %v1048_v7 = vld [vmem:[#allocation2 + $0xe8] sm:$0xf0]  ;;  %v1263_v10 = vld [vmem:[#allocation2 + $0x14] sm:$0xf0]  ;;  %v1038_v11 = vld [vmem:[#allocation2 + $0xd0] sm:$0xf] }
  0x1d   :  { %930 = vmatmul.msk.bf16.vlgmr.msra.gmra.mxu1 %vm126_vm0, %v71_v44  ;;  %365 = vmatpush.bf16.msra.mxu2 %v967_v49  ;;  %v1051_v8 = vor.u32 %v1288_v6, %v1048_v7  ;;  %v943_v12 = vor.u32 %v1263_v10, %v942_v9  ;;  %v1287_v13 = vld [vmem:[#allocation2 + $0xd4] sm:$0xf0]  ;;  %v1262_v14 = vld [vmem:[#allocation2 + $0x14] sm:$0xf]  ;;  %v944_v15 = vld [vmem:[#allocation2 + $0x18] sm:$0xf0] }
  0x1e   :  { %147 = vmatpush.bf16.msrb.mxu1 %v929_v31  ;;  %391 = vmatpush.bf16.msra.mxu0 %v971_v50  ;;  %v1039_v16 = vor.u32 %v1287_v13, %v1038_v11  ;;  %v947_v17 = vor.u32 %v1262_v14, %v944_v15  ;;  %v1286_v18 = vld [vmem:[#allocation2 + $0xd4] sm:$0xf]  ;;  %v1040_v19 = vld [vmem:[#allocation2 + $0xd8] sm:$0xf0]  ;;  %v934_v21 = vld [vmem:[#allocation2] sm:$0xf] }
  0x1f   :  { %v1043_v20 = vor.u32 %v1286_v18, %v1040_v19  ;;  %v1261_v22 = vld [vmem:[#allocation2 + $0x4] sm:$0xf0]  ;;  %v1030_v23 = vld [vmem:[#allocation2 + $0xc0] sm:$0xf]  ;;  %v1260_v26 = vld [vmem:[#allocation2 + $0x4] sm:$0xf] }
  0x20   :  { %377 = vmatpush.bf16.msra.mxu3 %v1039_v16  ;;  %v935_v24 = vor.u32 %v1261_v22, %v934_v21  ;;  %v1285_v25 = vld [vmem:[#allocation2 + $0xc4] sm:$0xf0]  ;;  %v936_v27 = vld [vmem:[#allocation2 + $0x8] sm:$0xf0]  ;;  %v1284_v30 = vld [vmem:[#allocation2 + $0xc4] sm:$0xf] }
  0x21   :  { %366 = vmatpush.bf16.msra.mxu2 %v959_v58  ;;  %v1031_v28 = vor.u32 %v1285_v25, %v1030_v23  ;;  %v939_v29 = vor.u32 %v1260_v26, %v936_v27  ;;  %v1032_v31 = vld [vmem:[#allocation2 + $0xc8] sm:$0xf0]  ;;  %v1022_v33 = vld [vmem:[#allocation2 + $0xb0] sm:$0xf]  ;;  %v1283_v34 = vld [vmem:[#allocation2 + $0xb4] sm:$0xf0] }
  0x22   :  { %148 = vmatpush.bf16.msrb.mxu1 %v921_v46  ;;  %392 = vmatpush.bf16.msra.mxu0 %v963_v59  ;;  %v1035_v32 = vor.u32 %v1284_v30, %v1032_v31  ;;  %v1282_v35 = vld [vmem:[#allocation2 + $0xb4] sm:$0xf]  ;;  %v1023_v36 = vor.u32 %v1283_v34, %v1022_v33  ;;  %v1024_v37 = vld [vmem:[#allocation2 + $0xb8] sm:$0xf0]  ;;  %v1014_v39 = vld [vmem:[#allocation2 + $0xa0] sm:$0xf] }
  0x23   :  { %v1027_v38 = vor.u32 %v1282_v35, %v1024_v37  ;;  %v1281_v40 = vld [vmem:[#allocation2 + $0xa4] sm:$0xf0]  ;;  %v1280_v41 = vld [vmem:[#allocation2 + $0xa4] sm:$0xf]  ;;  %v1016_v42 = vld [vmem:[#allocation2 + $0xa8] sm:$0xf0] }
  0x24   :  { %378 = vmatpush.bf16.msra.mxu3 %v1031_v28  ;;  %v1015_v43 = vor.u32 %v1281_v40, %v1014_v39  ;;  %v1006_v45 = vld [vmem:[#allocation2 + $0x90] sm:$0xf]  ;;  %v1279_v46 = vld [vmem:[#allocation2 + $0x94] sm:$0xf0]  ;;  %v1278_v47 = vld [vmem:[#allocation2 + $0x94] sm:$0xf] }
  0x25   :  { %367 = vmatpush.bf16.msra.mxu2 %v951_v4  ;;  %v1007_v48 = vor.u32 %v1279_v46, %v1006_v45  ;;  %v1008_v49 = vld [vmem:[#allocation2 + $0x98] sm:$0xf0]  ;;  %v998_v51 = vld [vmem:[#allocation2 + $0x80] sm:$0xf]  ;;  %v1277_v52 = vld [vmem:[#allocation2 + $0x84] sm:$0xf0] }
  0x26   :  { %149 = vmatpush.bf16.msrb.mxu1 %v913_v55  ;;  %393 = vmatpush.bf16.msra.mxu0 %v955_v5  ;;  %v1011_v50 = vor.u32 %v1278_v47, %v1008_v49  ;;  %v1276_v53 = vld [vmem:[#allocation2 + $0x84] sm:$0xf]  ;;  %v999_v54 = vor.u32 %v1277_v52, %v998_v51  ;;  %v1000_v55 = vld [vmem:[#allocation2 + $0x88] sm:$0xf0]  ;;  %v80_v57 = vld [vmem:[%s1644_s2] sm:$0x3] }
  0x27   :  { %v1003_v56 = vor.u32 %v1276_v53, %v1000_v55  ;;  %v1182_v58 = vld [vmem:[#allocation4 + $0xf0] sm:$0xf]  ;;  %v1323_v59 = vld [vmem:[#allocation4 + $0xf4] sm:$0xf0]  ;;  %v1322_v60 = vld [vmem:[#allocation4 + $0xf4] sm:$0xf] }
  0x28   :  { %379 = vmatpush.bf16.msra.mxu3 %v1023_v36  ;;  %v1183_v61 = vor.u32 %v1323_v59, %v1182_v58  ;;  %v1184_v62 = vld [vmem:[#allocation4 + $0xf8] sm:$0xf0]  ;;  %v1174_v63 = vld [vmem:[#allocation4 + $0xe0] sm:$0xf]  ;;  %v1321_v0 = vld [vmem:[#allocation4 + $0xe4] sm:$0xf0] }
  0x29   :  { %368 = vmatpush.bf16.msra.mxu2 %v943_v12  ;;  %v1187_v1 = vor.u32 %v1322_v60, %v1184_v62  ;;  %v1118_v4 = vld [vmem:[#allocation4 + $0x70] sm:$0xf]  ;;  %v1175_v5 = vor.u32 %v1321_v0, %v1174_v63  ;;  %v1307_v6 = vld [vmem:[#allocation4 + $0x74] sm:$0xf0]  ;;  %v1306_v7 = vld [vmem:[#allocation4 + $0x74] sm:$0xf] }
  0x2a   :  { %150 = vmatpush.bf16.msrb.mxu1 %v905_v2  ;;  %394 = vmatpush.bf16.msra.mxu0 %v947_v17  ;;  %v1320_v2 = vld [vmem:[#allocation4 + $0xe4] sm:$0xf]  ;;  %v1119_v10 = vor.u32 %v1307_v6, %v1118_v4  ;;  %v82_v12 = vperm.slane %v80_v57, 0  ;;  %v83_v19 = vperm.slane %v80_v57, 1  ;;  %v1166_v26 = vld [vmem:[#allocation4 + $0xd0] sm:$0xf] }
  0x2b   :  { %v1319_v27 = vld [vmem:[#allocation4 + $0xd4] sm:$0xf0]  ;;  %v1318_v28 = vld [vmem:[#allocation4 + $0xd4] sm:$0xf]  ;;  %v1168_v30 = vld [vmem:[#allocation4 + $0xd8] sm:$0xf0] }
  0x2c   :  { %380 = vmatpush.bf16.msra.mxu3 %v1015_v43  ;;  %v1171_v31 = vor.u32 %v1318_v28, %v1168_v30  ;;  %v1305_v33 = vld [vmem:[#allocation4 + $0x64] sm:$0xf0]  ;;  %v1304_v34 = vld [vmem:[#allocation4 + $0x64] sm:$0xf]  ;;  %v1112_v36 = vld [vmem:[#allocation4 + $0x68] sm:$0xf0] }
  0x2d   :  { %931 = vmatmul.msk.bf16.vlgmr.msrb.gmra.mxu1 %vm126_vm0, %v71_v44  ;;  %369 = vmatpush.bf16.msra.mxu2 %v935_v24  ;;  %v1019_v44 = vor.u32 %v1280_v41, %v1016_v42  ;;  %v1158_v37 = vld [vmem:[#allocation4 + $0xc0] sm:$0xf]  ;;  %v1115_v39 = vor.u32 %v1304_v34, %v1112_v36  ;;  %v1316_v41 = vld [vmem:[#allocation4 + $0xc4] sm:$0xf]  ;;  %v1160_v42 = vld [vmem:[#allocation4 + $0xc8] sm:$0xf0] }
  0x2e   :  { %401 = vmatpush.bf16.msra.mxu1 %v1059_v3  ;;  %395 = vmatpush.bf16.msra.mxu0 %v939_v29  ;;  %v1176_v3 = vld [vmem:[#allocation4 + $0xe8] sm:$0xf0]  ;;  %v1167_v29 = vor.u32 %v1319_v27, %v1166_v26  ;;  %v1163_v43 = vor.u32 %v1316_v41, %v1160_v42  ;;  %v1303_v45 = vld [vmem:[#allocation4 + $0x54] sm:$0xf0]  ;;  %v1302_v46 = vld [vmem:[#allocation4 + $0x54] sm:$0xf] }
  0x2f   :  { %v1179_v9 = vor.u32 %v1320_v2, %v1176_v3  ;;  %v1315_v51 = vld [vmem:[#allocation4 + $0xb4] sm:$0xf0]  ;;  %v1314_v52 = vld [vmem:[#allocation4 + $0xb4] sm:$0xf]  ;;  %v1301_v57 = vld [vmem:[#allocation4 + $0x44] sm:$0xf0] }
  0x30   :  { %381 = vmatpush.bf16.msra.mxu3 %v1007_v48  ;;  %v1104_v48 = vld [vmem:[#allocation4 + $0x58] sm:$0xf0]  ;;  %v1300_v58 = vld [vmem:[#allocation4 + $0x44] sm:$0xf]  ;;  %v1096_v60 = vld [vmem:[#allocation4 + $0x48] sm:$0xf0] }
  0x31   :  { %620 = vmatpush.bf16.msrb.mxu2 %v1119_v10  ;;  %v1107_v49 = vor.u32 %v1302_v46, %v1104_v48  ;;  %v1313_v62 = vld [vmem:[#allocation4 + $0xa4] sm:$0xf0]  ;;  %v1099_v63 = vor.u32 %v1300_v58, %v1096_v60  ;;  %v1144_v2 = vld [vmem:[#allocation4 + $0xa8] sm:$0xf0]  ;;  %v1086_v4 = vld [vmem:[#allocation4 + $0x30] sm:$0xf] }
  0x32   :  { %402 = vmatpush.bf16.msra.mxu1 %v1051_v8  ;;  %v1120_v8 = vld [vmem:[#allocation4 + $0x78] sm:$0xf0]  ;;  %v1298_v6 = vld [vmem:[#allocation4 + $0x34] sm:$0xf]  ;;  %v1134_v10 = vld [vmem:[#allocation4 + $0x90] sm:$0xf] }
  0x33   :  { %v1123_v11 = vor.u32 %v1306_v7, %v1120_v8  ;;  %v1088_v8 = vld [vmem:[#allocation4 + $0x38] sm:$0xf0]  ;;  %v1128_v26 = vld [vmem:[#allocation4 + $0x88] sm:$0xf0]  ;;  %v1070_v28 = vld [vmem:[#allocation4 + $0x10] sm:$0xf] }
  0x34   :  { %382 = vmatpush.bf16.msra.mxu3 %v999_v54  ;;  %v1152_v54 = vld [vmem:[#allocation4 + $0xb8] sm:$0xf0]  ;;  %v1294_v30 = vld [vmem:[#allocation4 + $0x14] sm:$0xf]  ;;  %v1062_v34 = vld [vmem:[#allocation4] sm:$0xf] }
  0x35   :  { %646 = vmatpush.bf16.msrb.mxu0 %v1123_v11  ;;  %v1155_v55 = vor.u32 %v1314_v52, %v1152_v54  ;;  %v1311_v11 = vld [vmem:[#allocation4 + $0x94] sm:$0xf0]  ;;  %v1292_v36 = vld [vmem:[#allocation4 + $0x4] sm:$0xf]  ;;  %v1329_v46 = vld [vmem:[%s1649_s7 + $0x28] sm:$0xff] }
  0x36   :  { %403 = vmatpush.bf16.msra.mxu1 %v1043_v20  ;;  %v1331_v41 = vld [vmem:[%s1649_s7 + $0x38] sm:$0xff]  ;;  %v196_v48 = vld [vmem:[%s1646_s4] sm:$0x3] }
  0x38   :  { %633 = vmatpush.bf16.msrb.mxu3 %v1183_v61  ;;  %v1142_v61 = vld [vmem:[#allocation4 + $0xa0] sm:$0xf] }
  0x39   :  { %647 = vmatpush.bf16.msrb.mxu0 %v1115_v39  ;;  %v1143_v0 = vor.u32 %v1313_v62, %v1142_v61 }
  0x3a   :  { %404 = vmatpush.bf16.msra.mxu1 %v1035_v32  ;;  %v1110_v32 = vld [vmem:[#allocation4 + $0x60] sm:$0xf] }
  0x3b   :  { %v1111_v35 = vor.u32 %v1305_v33, %v1110_v32  ;;  %v1072_v32 = vld [vmem:[#allocation4 + $0x18] sm:$0xf0] }
  0x3c   :  { %634 = vmatpush.bf16.msrb.mxu3 %v1175_v5  ;;  %v1299_v5 = vld [vmem:[#allocation4 + $0x34] sm:$0xf0]  ;;  %v1075_v33 = vor.u32 %v1294_v30, %v1072_v32 }
  0x3d   :  { %621 = vmatpush.bf16.msrb.mxu2 %v1111_v35  ;;  %648 = vmatpush.bf16.msrb.mxu0 %v1107_v49  ;;  %v1087_v7 = vor.u32 %v1299_v5, %v1086_v4  ;;  %v1293_v35 = vld [vmem:[#allocation4 + $0x4] sm:$0xf0]  ;;  %v1335_v4 = vld [vmem:[%s1649_s7 + $0x58] sm:$0xff]  ;;  %v1328_v5 = vld [vmem:[%s1649_s7 + $0x20] sm:$0xff] }
  0x3e   :  { %405 = vmatpush.bf16.msra.mxu1 %v1027_v38  ;;  %v1317_v38 = vld [vmem:[#allocation4 + $0xc4] sm:$0xf0] }
  0x3f   :  { %v1159_v40 = vor.u32 %v1317_v38, %v1158_v37  ;;  %v1063_v37 = vor.u32 %v1293_v35, %v1062_v34  ;;  %v1064_v38 = vld [vmem:[#allocation4 + $0x8] sm:$0xf0]  ;;  %v864_v34 = vld [vmem:[%s1652_s10 + $0x78] sm:$0xff]  ;;  %v863_v35 = vld [vmem:[%s1652_s10 + $0x70] sm:$0xff] }
  0x40   :  { %635 = vmatpush.bf16.msrb.mxu3 %v1167_v29  ;;  %v1295_v29 = vld [vmem:[#allocation4 + $0x14] sm:$0xf0]  ;;  %v1067_v39 = vor.u32 %v1292_v36, %v1064_v38  ;;  %v862_v36 = vld [vmem:[%s1652_s10 + $0x68] sm:$0xff] }
  0x41   :  { %649 = vmatpush.bf16.msrb.mxu0 %v1099_v63  ;;  %v860_v38 = vld [vmem:[%s1652_s10 + $0x58] sm:$0xff] }
  0x42   :  { %406 = vmatpush.bf16.msra.mxu1 %v1019_v44  ;;  %v1102_v44 = vld [vmem:[#allocation4 + $0x50] sm:$0xf] }
  0x43   :  { %v1103_v47 = vor.u32 %v1303_v45, %v1102_v44  ;;  %v1330_v44 = vld [vmem:[%s1649_s7 + $0x30] sm:$0xff]  ;;  %v1337_v45 = vld [vmem:[%s1649_s7 + $0x68] sm:$0xff] }
  0x44   :  { %636 = vmatpush.bf16.msrb.mxu3 %v1159_v40  ;;  %v1339_v40 = vld [vmem:[%s1649_s7 + $0x78] sm:$0xff] }
  0x45   :  { %622 = vmatpush.bf16.msrb.mxu2 %v1103_v47 }
  0x46   :  { %407 = vmatpush.bf16.msra.mxu1 %v1011_v50  ;;  %v1150_v50 = vld [vmem:[#allocation4 + $0xb0] sm:$0xf] }
  0x47   :  { %v1151_v53 = vor.u32 %v1315_v51, %v1150_v50  ;;  %v1336_v50 = vld [vmem:[%s1649_s7 + $0x60] sm:$0xff]  ;;  %v199_v51 = vperm.slane %v196_v48, 1 }
  0x49   :  { %637 = vmatpush.bf16.msrb.mxu3 %v1151_v53 }
  0x4a   :  { %408 = vmatpush.bf16.msra.mxu1 %v1003_v56  ;;  %v1094_v56 = vld [vmem:[#allocation4 + $0x40] sm:$0xf] }
  0x4b   :  { %v1095_v59 = vor.u32 %v1301_v57, %v1094_v56 }
  0x4d   :  { %623 = vmatpush.bf16.msrb.mxu2 %v1095_v59  ;;  %638 = vmatpush.bf16.msrb.mxu3 %v1143_v0 }
  0x4e   :  { %659 = vmatpush.bf16.msrb.mxu1 %v1187_v1  ;;  %v1312_v1 = vld [vmem:[#allocation4 + $0xa4] sm:$0xf] }
  0x4f   :  { %v1147_v3 = vor.u32 %v1312_v1, %v1144_v2 }
  0x51   :  { %624 = vmatpush.bf16.msrb.mxu2 %v1087_v7  ;;  %v1327_v7 = vld [vmem:[%s1649_s7 + $0x18] sm:$0xff] }
  0x52   :  { %660 = vmatpush.bf16.msrb.mxu1 %v1179_v9  ;;  %v1091_v9 = vor.u32 %v1298_v6, %v1088_v8  ;;  %v1334_v6 = vld [vmem:[%s1649_s7 + $0x50] sm:$0xff]  ;;  %v1333_v8 = vld [vmem:[%s1649_s7 + $0x48] sm:$0xff] }
  0x54   :  { %650 = vmatpush.bf16.msrb.mxu0 %v1091_v9  ;;  %v1326_v9 = vld [vmem:[%s1649_s7 + $0x10] sm:$0xff] }
  0x56   :  { %661 = vmatpush.bf16.msrb.mxu1 %v1171_v31  ;;  %v1071_v31 = vor.u32 %v1295_v29, %v1070_v28 }
  0x5a   :  { %662 = vmatpush.bf16.msrb.mxu1 %v1163_v43  ;;  %v1338_v43 = vld [vmem:[%s1649_s7 + $0x70] sm:$0xff] }
  0x5e   :  { %663 = vmatpush.bf16.msrb.mxu1 %v1155_v55  ;;  %v198_v55 = vperm.slane %v196_v48, 0 }
  0x62   :  { %664 = vmatpush.bf16.msrb.mxu1 %v1147_v3 }
  0x9a   :  { %v139_v13 = vpop.f32.mrf.mxu1 }
  0x9b   :  { %v140_v14 = vadd.f32 %v139_v13, %v82_v12  ;;  %v1310_v12 = vld [vmem:[#allocation4 + $0x94] sm:$0xf]  ;;  %v1135_v13 = vor.u32 %v1311_v11, %v1134_v10  ;;  %v1332_v10 = vld [vmem:[%s1649_s7 + $0x40] sm:$0xff]  ;;  %v1325_v11 = vld [vmem:[%s1649_s7 + $0x8] sm:$0xff] }
  0x9d   :  { %v158_v15 = vmul.f32 0.01, %v140_v14  ;;  %vm156_vm1 = vcmp.gt.f32.partialorder %v140_v14, 0.0  ;;  %639 = vmatpush.bf16.msrb.mxu3 %v1135_v13 }
  0x9f   :  { %v160_v16 = vsel %vm156_vm1, %v140_v14, %v158_v15  ;;  %v1136_v14 = vld [vmem:[#allocation4 + $0x98] sm:$0xf0] }
  0xa0   :  { %v162_v17 = vpack.c.bf16 %v160_v16, %v160_v16  ;;  %v1139_v15 = vor.u32 %v1310_v12, %v1136_v14  ;;  %v1078_v16 = vld [vmem:[#allocation4 + $0x20] sm:$0xf] }
  0xa1   :  { %v1324_v12 = vld [vmem:[%s1649_s7] sm:$0xff] }
  0xa2   :  { %v141_v18 = vpop.f32.mrf.mxu1  ;;  %370 = vmatmul.bf16.vlgmr.msra.gmra.mxu2 %v162_v17  ;;  %396 = vmatmul.bf16.vlgmr.msra.gmra.mxu0 %v162_v17  ;;  %v1297_v17 = vld [vmem:[#allocation4 + $0x24] sm:$0xf0]  ;;  %v454_v14 = vld [vmem:[%s1648_s6] sm:$0x3] }
  0xa3   :  { %v1296_v18 = vld [vmem:[#allocation4 + $0x24] sm:$0xf]  ;;  %665 = vmatpush.bf16.msrb.mxu1 %v1139_v15  ;;  %v457_v15 = vperm.slane %v454_v14, 1 }
  0xaa   :  { %v152_v20 = vpop.f32.mrf.mxu1 }
  0xab   :  { %v153_v21 = vadd.f32 %v152_v20, %v83_v19  ;;  %v1079_v19 = vor.u32 %v1297_v17, %v1078_v16  ;;  %v1080_v20 = vld [vmem:[#allocation4 + $0x28] sm:$0xf0] }
  0xad   :  { %v159_v22 = vmul.f32 0.01, %v153_v21  ;;  %vm157_vm2 = vcmp.gt.f32.partialorder %v153_v21, 0.0  ;;  %625 = vmatpush.bf16.msrb.mxu2 %v1079_v19 }
  0xaf   :  { %v161_v23 = vsel %vm157_vm2, %v153_v21, %v159_v22  ;;  %v1083_v21 = vor.u32 %v1296_v18, %v1080_v20  ;;  %v1126_v22 = vld [vmem:[#allocation4 + $0x80] sm:$0xf] }
  0xb0   :  { %v163_v24 = vpack.c.bf16 %v161_v23, %v161_v23  ;;  %v1309_v23 = vld [vmem:[#allocation4 + $0x84] sm:$0xf0] }
  0xb1   :  { %651 = vmatpush.bf16.msrb.mxu0 %v1083_v21  ;;  %626 = vmatpush.bf16.msrb.mxu2 %v1071_v31  ;;  %v456_v21 = vperm.slane %v454_v14, 0 }
  0xb2   :  { %v154_v25 = vpop.f32.mrf.mxu1  ;;  %383 = vmatmul.bf16.vlgmr.msra.gmra.mxu3 %v163_v24  ;;  %409 = vmatmul.bf16.vlgmr.msra.gmra.mxu1 %v163_v24  ;;  %v1308_v24 = vld [vmem:[#allocation4 + $0x84] sm:$0xf] }
  0xb3   :  { %v1127_v25 = vor.u32 %v1309_v23, %v1126_v22  ;;  %v1131_v27 = vor.u32 %v1308_v24, %v1128_v26 }
  0xb5   :  { %640 = vmatpush.bf16.msrb.mxu3 %v1127_v25  ;;  %666 = vmatpush.bf16.msrb.mxu1 %v1131_v27 }
  0xb6   :  { %652 = vmatpush.bf16.msrb.mxu0 %v1075_v33  ;;  %627 = vmatpush.bf16.msrb.mxu2 %v1063_v37  ;;  %v861_v37 = vld [vmem:[%s1652_s10 + $0x60] sm:$0xff] }
  0xb9   :  { %825 = vmatpush.bf16.msra.mxu3 %v1339_v40  ;;  %v858_v40 = vld [vmem:[%s1652_s10 + $0x48] sm:$0xff] }
  0xba   :  { %653 = vmatpush.bf16.msrb.mxu0 %v1067_v39  ;;  %812 = vmatpush.bf16.msra.mxu2 %v1331_v41  ;;  %v859_v39 = vld [vmem:[%s1652_s10 + $0x50] sm:$0xff]  ;;  %v857_v41 = vld [vmem:[%s1652_s10 + $0x40] sm:$0xff] }
  0xbd   :  { %826 = vmatpush.bf16.msra.mxu3 %v1338_v43 }
  0xbe   :  { %813 = vmatpush.bf16.msra.mxu2 %v1330_v44  ;;  %865 = vmatpush.msra.mxu0 %v864_v34  ;;  %v838_v44 = vlaneseq }
  0xc0   :  { %866 = vmatpush.msra.mxu0 %v863_v35 }
  0xc1   :  { %827 = vmatpush.bf16.msra.mxu3 %v1337_v45  ;;  %v1344_v45 = vld [vmem:[%s1650_s8] ss:$0 sm:$0xff] }
  0xc2   :  { %814 = vmatpush.bf16.msra.mxu2 %v1329_v46  ;;  %867 = vmatpush.msra.mxu0 %v862_v36  ;;  %v839_v46 = vand.u32 127, %v838_v44 }
  0xc4   :  { %868 = vmatpush.msra.mxu0 %v861_v37  ;;  %vm840_vm7 = vcmp.lt.s32.totalorder %v839_v46, 16 }
  0xc5   :  { %828 = vmatpush.bf16.msra.mxu3 %v1336_v50 }
  0xc6   :  { %815 = vmatpush.bf16.msra.mxu2 %v1328_v5  ;;  %869 = vmatpush.msra.mxu0 %v860_v38 }
  0xc8   :  { %870 = vmatpush.msra.mxu0 %v859_v39 }
  0xc9   :  { %829 = vmatpush.bf16.msra.mxu3 %v1335_v4 }
  0xca   :  { %816 = vmatpush.bf16.msra.mxu2 %v1327_v7  ;;  %871 = vmatpush.msra.mxu0 %v858_v40 }
  0xcc   :  { %872 = vmatpush.msra.mxu0 %v857_v41 }
  0xcd   :  { %830 = vmatpush.bf16.msra.mxu3 %v1334_v6 }
  0xce   :  { %817 = vmatpush.bf16.msra.mxu2 %v1326_v9 }
  0xd1   :  { %831 = vmatpush.bf16.msra.mxu3 %v1333_v8 }
  0xd2   :  { %818 = vmatpush.bf16.msra.mxu2 %v1325_v11 }
  0xd5   :  { %832 = vmatpush.bf16.msra.mxu3 %v1332_v10 }
  0xd6   :  { %819 = vmatpush.bf16.msra.mxu2 %v1324_v12 }
 0x11f   :  { %v397_v42 = vpop.f32.mrf.mxu0 }
 0x120   :  { %v398_v53 = vadd.f32 %v397_v42, %v199_v51  ;;  %v856_v42 = vld [vmem:[%s1652_s10 + $0x38] sm:$0xff] }
 0x121   :  { %873 = vmatpush.msra.mxu0 %v856_v42 }
 0x125   :  { %v371_v47 = vpop.f32.mrf.mxu2 }
 0x126   :  { %v372_v58 = vadd.f32 %v371_v47, %v198_v55  ;;  %v853_v55 = vld [vmem:[%s1652_s10 + $0x20] sm:$0xff] }
 0x127   :  { %v399_v49 = vpop.f32.mrf.mxu0 }
 0x12d   :  { %v373_v52 = vpop.f32.mrf.mxu2 }
 0x12f   :  { %v410_v54 = vpop.f32.mrf.mxu1 }
 0x130   :  { %v411_v56 = vadd.f32 %v410_v54, %v398_v53  ;;  %v855_v53 = vld [vmem:[%s1652_s10 + $0x30] sm:$0xff]  ;;  %v854_v54 = vld [vmem:[%s1652_s10 + $0x28] sm:$0xff] }
 0x131   :  { %874 = vmatpush.msra.mxu0 %v855_v53 }
 0x132   :  { %vm415_vm3 = vcmp.gt.f32.partialorder %v411_v56, 0.0  ;;  %v417_v57 = vmul.f32 0.01, %v411_v56 }
 0x133   :  { %875 = vmatpush.msra.mxu0 %v854_v54 }
 0x134   :  { %v419_v59 = vsel %vm415_vm3, %v411_v56, %v417_v57  ;;  %v852_v56 = vld [vmem:[%s1652_s10 + $0x18] sm:$0xff]  ;;  %v851_v57 = vld [vmem:[%s1652_s10 + $0x10] sm:$0xff] }
 0x135   :  { %v384_v60 = vpop.f32.mrf.mxu3  ;;  %v421_v61 = vpack.c.bf16 %v419_v59, %v419_v59  ;;  %876 = vmatpush.msra.mxu0 %v853_v55  ;;  %v849_v59 = vld [vmem:[%s1652_s10] sm:$0xff] }
 0x136   :  { %v385_v62 = vadd.f32 %v384_v60, %v372_v58  ;;  %v850_v58 = vld [vmem:[%s1652_s10 + $0x8] sm:$0xff] }
 0x137   :  { %v412_v63 = vpop.f32.mrf.mxu1  ;;  %641 = vmatmul.bf16.vlgmr.msrb.gmra.mxu3 %v421_v61  ;;  %667 = vmatmul.bf16.vlgmr.msrb.gmra.mxu1 %v421_v61 }
 0x138   :  { %vm414_vm4 = vcmp.gt.f32.partialorder %v385_v62, 0.0  ;;  %v416_v0 = vmul.f32 0.01, %v385_v62  ;;  %877 = vmatpush.msra.mxu0 %v852_v56  ;;  %v847_v63 = vld [vmem:[%s1651_s9] sm:$0xff] }
 0x13a   :  { %v418_v1 = vsel %vm414_vm4, %v385_v62, %v416_v0  ;;  %878 = vmatpush.msra.mxu0 %v851_v57 }
 0x13b   :  { %v420_v2 = vpack.c.bf16 %v418_v1, %v418_v1 }
 0x13c   :  { %879 = vmatpush.msra.mxu0 %v850_v58 }
 0x13d   :  { %v386_v3 = vpop.f32.mrf.mxu3  ;;  %628 = vmatmul.bf16.vlgmr.msrb.gmra.mxu2 %v420_v2  ;;  %654 = vmatmul.bf16.vlgmr.msrb.gmra.mxu0 %v420_v2 }
 0x13e   :  { %880 = vmatpush.msra.mxu0 %v849_v59 }
 0x1b4   :  { %v668_v13 = vpop.f32.mrf.mxu1 }
 0x1ba   :  { %v642_v16 = vpop.f32.mrf.mxu3  ;;  %v655_v17 = vpop.f32.mrf.mxu0 }
 0x1bb   :  { %v656_v18 = vadd.f32 %v655_v17, %v457_v15 }
 0x1bc   :  { %v670_v19 = vpop.f32.mrf.mxu1 }
 0x1bd   :  { %v669_v20 = vadd.f32 %v668_v13, %v656_v18 }
 0x1bf   :  { %vm673_vm5 = vcmp.gt.f32.partialorder %v669_v20, 0.0  ;;  %v675_v22 = vmul.f32 0.01, %v669_v20 }
 0x1c0   :  { %v629_v23 = vpop.f32.mrf.mxu2 }
 0x1c1   :  { %v677_v24 = vsel %vm673_vm5, %v669_v20, %v675_v22  ;;  %v630_v25 = vadd.f32 %v629_v23, %v456_v21 }
 0x1c2   :  { %v679_v26 = vpack.c.bf16 %v677_v24, %v677_v24  ;;  %v644_v27 = vpop.f32.mrf.mxu3  ;;  %v657_v28 = vpop.f32.mrf.mxu0 }
 0x1c3   :  { %v643_v29 = vadd.f32 %v642_v16, %v630_v25 }
 0x1c4   :  { %833 = vmatmul.bf16.vlgmr.msra.gmra.mxu3 %v679_v26 }
 0x1c5   :  { %vm672_vm6 = vcmp.gt.f32.partialorder %v643_v29, 0.0  ;;  %v674_v30 = vmul.f32 0.01, %v643_v29 }
 0x1c7   :  { %v676_v31 = vsel %vm672_vm6, %v643_v29, %v674_v30 }
 0x1c8   :  { %v678_v32 = vpack.c.bf16 %v676_v31, %v676_v31  ;;  %v631_v33 = vpop.f32.mrf.mxu2 }
 0x1ca   :  { %820 = vmatmul.bf16.vlgmr.msra.gmra.mxu2 %v678_v32 }
 0x247   :  { %v834_v43 = vpop.f32.mrf.mxu3 }
 0x24d   :  { %v821_v47 = vpop.f32.mrf.mxu2 }
 0x24e   :  { %v822_v48 = vadd.f32 %v1344_v45, %v821_v47 }
 0x24f   :  { %v836_v49 = vpop.f32.mrf.mxu3 }
 0x250   :  { %v835_v50 = vadd.f32 %v834_v43, %v822_v48 }
 0x252   :  { %v841_v51 = vsel %vm840_vm7, %v835_v50, -1e+30 }
 0x253   :  { %842 = vmax.xlane.f32.xlu0 %v841_v51 }
 0x255   :  { %v823_v52 = vpop.f32.mrf.mxu2 }
 0x2c6   :  { %v843_v60 = vpop.xlane.xlu0 %842 }
 0x2c7   :  { %v844_v61 = vsub.f32 %v841_v51, %v843_v60 }
 0x2c9   :  { %v845_v62 = vmul.f32 1.442695, %v844_v61 }
 0x2cb   :  { %1345 = vpow2.f32 %v845_v62 }
 0x2d1   :  { %v1346_v0 = vpop.eup %1345 }
 0x2d2   :  { %v848_v1 = vmul.f32 %v1346_v0, %v847_v63 }
 0x2d4   :  { %881 = vmatmul.f32.vlgmr.msra.gmra.mxu0 %v848_v1  ;;  %1347 = vlog2.f32 %v848_v1 }
 0x2da   :  { %v1348_v3 = vpop.eup %1347 }
 0x2db   :  { %v886_v5 = vmul.f32 0.6931472, %v1348_v3 }
 0x351   :  { %v882_v2 = vpop.f32.mrf.mxu0 }
 0x352   :  { %1349 = vlog2.f32 %v882_v2 }
 0x358   :  { %v1350_v4 = vpop.eup %1349 }
 0x359   :  { %v888_v6 = vmul.f32 0.6931472, %v1350_v4 }
 0x35b   :  { %v889_v7 = vsub.f32 %v886_v5, %v888_v6 }
 0x35d   :  { %v890_v8 = vsel %vm840_vm7, %v889_v7, 0.0 }
 0x35e   :  { %891 = vst [vmem:[%s1653_s11] sm:$0xff] %v890_v8 }
 0x35f   :  { %896 = vsyncpa [#allocation3], 1 }
 0x360   :  { %897 = vsyncpa [#allocation5], 1 }

</bundles_post_ra>
